<compile_context>
chip_gen: v7x
topology: tpu7x:2x2x1
jax: 0.10.0
libtpu: 0.0.40
codegen_flags: <defaults>
</compile_context>

<pallas_src>
import functools
import math

import jax
import jax.numpy as jnp
from jax import lax
from jax.experimental import pallas as pl
from jax.experimental.pallas import tpu as pltpu

# contract dim-1 of both operands: computes x @ w.T without materializing w.T
_DN = (((1,), (1,)), ((), ()))


# ----------------------------------------------------------------------------
# Kernel A: node-embedding transforms
#   Es = tanh(alpha * (S @ W1.T + b1)),  Et = tanh(alpha * (T @ W2.T + b2))
# Tiny (N x node_dim) -> gridless.
# ----------------------------------------------------------------------------
def _emb_kernel(s_ref, t_ref, w1_ref, b1_ref, w2_ref, b2_ref,
                es_ref, et_ref, *, alpha):
    es_ref[...] = jnp.tanh(alpha * (
        lax.dot_general(s_ref[...], w1_ref[...], _DN,
                        preferred_element_type=jnp.float32) + b1_ref[...]))
    et_ref[...] = jnp.tanh(alpha * (
        lax.dot_general(t_ref[...], w2_ref[...], _DN,
                        preferred_element_type=jnp.float32) + b2_ref[...]))


def node_embeddings(node_emb_s, node_emb_t, w1, b1, w2, b2, *, alpha):
    n, d = node_emb_s.shape
    return pl.pallas_call(
        functools.partial(_emb_kernel, alpha=alpha),
        out_shape=(jax.ShapeDtypeStruct((n, d), jnp.float32),
                   jax.ShapeDtypeStruct((n, d), jnp.float32)),
    )(node_emb_s, node_emb_t, w1, b1.reshape(1, -1), w2, b2.reshape(1, -1))


# ----------------------------------------------------------------------------
# Kernel B: adaptive adjacency + fused top-k mask, row-tiled ("parallel")
#   a     = Es_blk @ Et_fullᵀ − Et_blk @ Es_fullᵀ        (MXU, no transposes)
#   adj   = relu(tanh(alpha * a))
#   keep the top_k entries per row of (adj + noise); others -> 0
# ----------------------------------------------------------------------------
def _ada_topk_kernel(es_full_ref, et_full_ref, es_blk_ref, et_blk_ref,
                     noise_ref, adj_ref, *, alpha, top_k):
    a = (lax.dot_general(es_blk_ref[...], et_full_ref[...], _DN,
                         preferred_element_type=jnp.float32)
         - lax.dot_general(et_blk_ref[...], es_full_ref[...], _DN,
                           preferred_element_type=jnp.float32))
    adj = jnp.maximum(jnp.tanh(alpha * a), 0.0)

    # Row-wise top-k, unrolled (k static & small). The uniform*0.01 noise
    # breaks ties, so a single max-reduce per iteration suffices.
    work = adj + noise_ref[...]
    mask = jnp.zeros_like(adj)
    for _ in range(top_k):
        row_max = jnp.max(work, axis=-1, keepdims=True)
        picked = work >= row_max
        mask = jnp.where(picked, 1.0, mask)
        work = jnp.where(picked, -jnp.inf, work)

    adj_ref[...] = adj * mask


def ada_adjacency_topk(es, et, noise, *, alpha, top_k, row_tile):
    n, d = es.shape
    grid = (n // row_tile,)
    return pl.pallas_call(
        functools.partial(_ada_topk_kernel, alpha=alpha, top_k=top_k),
        grid=grid,
        in_specs=[
            pl.BlockSpec((n, d), lambda i: (0, 0)),          # Es (resident)
            pl.BlockSpec((n, d), lambda i: (0, 0)),          # Et (resident)
            pl.BlockSpec((row_tile, d), lambda i: (i, 0)),   # Es row block
            pl.BlockSpec((row_tile, d), lambda i: (i, 0)),   # Et row block
            pl.BlockSpec((row_tile, n), lambda i: (i, 0)),   # noise row block
        ],
        out_specs=pl.BlockSpec((row_tile, n), lambda i: (i, 0)),
        out_shape=jax.ShapeDtypeStruct((n, n), jnp.float32),
        compiler_params=pltpu.CompilerParams(
            dimension_semantics=("parallel",)),
    )(es, et, es, et, noise)


# ----------------------------------------------------------------------------
# Kernel 2: time-series embedding MLP, row-tiled ("parallel")
#   dy = relu(X @ W1.T + b1) @ W2'.T + b2'     (BatchNorm folded into fc2)
# ----------------------------------------------------------------------------
def _ts_mlp_kernel(x_ref, w1_ref, b1_ref, w2_ref, b2_ref, out_ref):
    h = lax.dot_general(x_ref[...], w1_ref[...], _DN,
                        preferred_element_type=jnp.float32) + b1_ref[...]
    h = jnp.maximum(h, 0.0)
    out_ref[...] = lax.dot_general(h, w2_ref[...], _DN,
                                   preferred_element_type=jnp.float32) + b2_ref[...]


def ts_embedding(x, w1, b1, w2_folded, b2_folded, *, row_tile):
    rows, seq_len = x.shape
    h2 = w1.shape[0]
    hidden = w2_folded.shape[0]
    grid = (rows // row_tile,)
    return pl.pallas_call(
        _ts_mlp_kernel,
        grid=grid,
        in_specs=[
            pl.BlockSpec((row_tile, seq_len), lambda i: (i, 0)),
            pl.BlockSpec((h2, seq_len), lambda i: (0, 0)),
            pl.BlockSpec((1, h2), lambda i: (0, 0)),
            pl.BlockSpec((hidden, h2), lambda i: (0, 0)),
            pl.BlockSpec((1, hidden), lambda i: (0, 0)),
        ],
        out_specs=pl.BlockSpec((row_tile, hidden), lambda i: (i, 0)),
        out_shape=jax.ShapeDtypeStruct((rows, hidden), jnp.float32),
        compiler_params=pltpu.CompilerParams(
            dimension_semantics=("parallel",)),
    )(x, w1, b1.reshape(1, -1), w2_folded, b2_folded.reshape(1, -1))


# ----------------------------------------------------------------------------
# Kernel 3: dynamic-graph attention, grid = (2 halves, B batches), "parallel"
#   Q/K built from column-split WQ/WK segments (x1/x2 never materialized).
#   W = softmax(Q K.T)   (1/sqrt(hidden) pre-folded into WQ)
# ----------------------------------------------------------------------------
def _attn_kernel(dy_ref, tid_ref, diw_ref, e_ref,
                 wq_dy_ref, wq_tid_ref, wq_diw_ref, wq_e_ref,
                 wk_dy_ref, wk_tid_ref, wk_diw_ref, wk_e_ref, out_ref):
    def proj(w_dy, w_tid, w_diw, w_e):
        return (lax.dot_general(dy_ref[...], w_dy[...], _DN,
                                preferred_element_type=jnp.float32)
                + lax.dot_general(tid_ref[...], w_tid[...], _DN,
                                  preferred_element_type=jnp.float32)
                + lax.dot_general(diw_ref[...], w_diw[...], _DN,
                                  preferred_element_type=jnp.float32)
                + lax.dot_general(e_ref[...], w_e[...], _DN,
                                  preferred_element_type=jnp.float32))

    q = proj(wq_dy_ref, wq_tid_ref, wq_diw_ref, wq_e_ref)
    k = proj(wk_dy_ref, wk_tid_ref, wk_diw_ref, wk_e_ref)
    s = lax.dot_general(q, k, _DN, preferred_element_type=jnp.float32)
    s = s - jnp.max(s, axis=-1, keepdims=True)
    e = jnp.exp(s)
    # Exact normalization (approx reciprocal left row sums off by >1e-3).
    out_ref[...] = e / jnp.sum(e, axis=-1, keepdims=True)


def dy_attention(dy_feat, tid, diw, e_st, wq_scaled, wk, *, hidden_dim):
    b, n, ts_dim = dy_feat.shape
    dd = tid.shape[-1]
    dw = diw.shape[-1]
    nd = e_st.shape[-1]
    h = wq_scaled.shape[0]

    def split(w):
        o0, o1, o2 = ts_dim, ts_dim + dd, ts_dim + dd + dw
        return w[:, :o0], w[:, o0:o1], w[:, o1:o2], w[:, o2:]

    wq_dy, wq_tid, wq_diw, wq_e = split(wq_scaled)
    wk_dy, wk_tid, wk_diw, wk_e = split(wk)

    const2 = lambda shp: pl.BlockSpec(shp, lambda g, i: (0, 0))
    return pl.pallas_call(
        _attn_kernel,
        grid=(2, b),
        in_specs=[
            pl.BlockSpec((pl.Squeezed(), n, ts_dim), lambda g, i: (i, 0, 0)),
            pl.BlockSpec((pl.Squeezed(), n, dd), lambda g, i: (i, 0, 0)),
            pl.BlockSpec((pl.Squeezed(), n, dw), lambda g, i: (i, 0, 0)),
            pl.BlockSpec((pl.Squeezed(), n, nd), lambda g, i: (g, 0, 0)),
            const2((h, ts_dim)), const2((h, dd)), const2((h, dw)), const2((h, nd)),
            const2((h, ts_dim)), const2((h, dd)), const2((h, dw)), const2((h, nd)),
        ],
        out_specs=pl.BlockSpec((pl.Squeezed(), pl.Squeezed(), n, n),
                               lambda g, i: (g, i, 0, 0)),
        out_shape=jax.ShapeDtypeStruct((2, b, n, n), jnp.float32),
        compiler_params=pltpu.CompilerParams(
            dimension_semantics=("parallel", "parallel")),
    )(dy_feat, tid, diw, e_st,
      wq_dy, wq_tid, wq_diw, wq_e,
      wk_dy, wk_tid, wk_diw, wk_e)


# ----------------------------------------------------------------------------
# Full forward (glue in plain JAX, hot paths in the kernels above)
# ----------------------------------------------------------------------------
def graph_constructor_forward(params, history_data, node_emb_s, node_emb_t,
                              time_in_day_feat, day_in_week_feat, *,
                              tanh_alpha, top_k, hidden_dim, noise_key,
                              bn_eps=1e-5, adj_row_tile=8, mlp_row_tile=16):
    adjs = []
    n, nd = node_emb_s.shape

    # ---- use_pre branch skipped (use_pre=False, pre_graph=[]) ----

    # ---- use_ada branch ----
    es, et = node_embeddings(node_emb_s, node_emb_t,
                             params["lin1_w"], params["lin1_b"],
                             params["lin2_w"], params["lin2_b"],
                             alpha=tanh_alpha)
    # TODO(synk): tie-break noise is host-generated (jax.random); an in-kernel
    # pltpu.prng_random_bits draw would drop the N^2 HBM round trip at scale.
    noise = jax.random.uniform(noise_key, (n, n), dtype=jnp.float32) * 0.01
    adj = ada_adjacency_topk(es, et, noise, alpha=tanh_alpha, top_k=top_k,
                             row_tile=adj_row_tile)
    adjs += [adj, adj.T]

    # ---- use_dy branch ----
    tid = time_in_day_feat[:, -1, :, :]                        # (B, N, Dday)
    diw = day_in_week_feat[:, -1, :, :]                        # (B, N, Dweek)
    b, seq_len, num_nodes, _ = history_data.shape
    x = jnp.transpose(history_data[:, :, :, 0], (0, 2, 1)).reshape(
        b * num_nodes, seq_len)                                # (B*N, L)

    # Fold eval-mode BatchNorm1d into fc2 (exact):
    #   bn(h) = h*a + (beta - mean*a),  a = gamma / sqrt(var + eps)
    #   fc2(bn(h)) = h @ (W2 * a).T + (b2 + W2 @ (beta - mean*a))
    a = params["bn_gamma"] * lax.rsqrt(params["bn_var"] + bn_eps)
    w2_folded = params["fc2_w"] * a[None, :]
    b2_folded = params["fc2_b"] + params["fc2_w"] @ (params["bn_beta"]
                                                     - params["bn_mean"] * a)
    # TODO(synk): dropout/batchnorm training-mode randomness not reproduced;
    # inference semantics (identity dropout, running stats) are used instead.
    dy_feat = ts_embedding(x, params["fc1_w"], params["fc1_b"],
                           w2_folded, b2_folded, row_tile=mlp_row_tile)
    dy_feat = dy_feat.reshape(b, num_nodes, -1)                # (B, N, H)

    # Attention: half 0 uses Es, half 1 uses Et; 1/sqrt(hidden) folded into WQ.
    e_st = jnp.stack([es, et], axis=0)                         # (2, N, node_dim)
    wq_scaled = params["wq_w"] / math.sqrt(hidden_dim)
    w = dy_attention(dy_feat, tid, diw, e_st, wq_scaled, params["wk_w"],
                     hidden_dim=hidden_dim)
    adjs.append(w[0])
    adjs.append(w[1])
    return adjs


# ----------------------------------------------------------------------------
# Deterministic parameter init + example run
# ----------------------------------------------------------------------------
def init_params(key, *, node_dim, hidden_dim, input_seq_len, all_feat_dim):
    keys = jax.random.split(key, 8)
    h2 = hidden_dim * 2
    scale = 0.1
    params = {
        "lin1_w": scale * jax.random.normal(keys[0], (node_dim, node_dim), jnp.float32),
        "lin1_b": scale * jax.random.normal(keys[1], (node_dim,), jnp.float32),
        "lin2_w": scale * jax.random.normal(keys[2], (node_dim, node_dim), jnp.float32),
        "lin2_b": scale * jax.random.normal(keys[3], (node_dim,), jnp.float32),
        "fc1_w": scale * jax.random.normal(keys[4], (h2, input_seq_len), jnp.float32),
        "fc1_b": jnp.zeros((h2,), jnp.float32),
        "fc2_w": scale * jax.random.normal(keys[5], (hidden_dim, h2), jnp.float32),
        "fc2_b": jnp.zeros((hidden_dim,), jnp.float32),
        "bn_gamma": jnp.ones((h2,), jnp.float32),
        "bn_beta": jnp.zeros((h2,), jnp.float32),
        "bn_mean": jnp.zeros((h2,), jnp.float32),
        "bn_var": jnp.ones((h2,), jnp.float32),
        "wq_w": scale * jax.random.normal(keys[6], (hidden_dim, all_feat_dim), jnp.float32),
        "wk_w": scale * jax.random.normal(keys[7], (hidden_dim, all_feat_dim), jnp.float32),
    }
    return params


if __name__ == "__main__":
    # Small config consistent with the module's forward
    B = 2                 # batch_size
    L = 12                # input_seq_len
    N = 16                # num_nodes
    NODE_DIM = 8
    TIME_DAY_DIM = 8
    TIME_WEEK_DIM = 8
    HIDDEN = 16
    TOP_K = 4
    TANH_ALPHA = 3.0
    ALL_FEAT = HIDDEN + NODE_DIM + TIME_DAY_DIM + TIME_WEEK_DIM   # 40

    root = jax.random.PRNGKey(0)
    k_param, k_hist, k_es, k_et, k_tid, k_diw, k_noise = jax.random.split(root, 7)

    params = init_params(k_param, node_dim=NODE_DIM, hidden_dim=HIDDEN,
                         input_seq_len=L, all_feat_dim=ALL_FEAT)

    history_data = jax.random.normal(k_hist, (B, L, N, 1), jnp.float32)
    node_emb_s = jax.random.normal(k_es, (N, NODE_DIM), jnp.float32)
    node_emb_t = jax.random.normal(k_et, (N, NODE_DIM), jnp.float32)
    time_in_day_feat = jax.random.normal(k_tid, (B, L, N, TIME_DAY_DIM), jnp.float32)
    day_in_week_feat = jax.random.normal(k_diw, (B, L, N, TIME_WEEK_DIM), jnp.float32)

    adjs = graph_constructor_forward(
        params, history_data, node_emb_s, node_emb_t,
        time_in_day_feat, day_in_week_feat,
        tanh_alpha=TANH_ALPHA, top_k=TOP_K, hidden_dim=HIDDEN,
        noise_key=k_noise, adj_row_tile=8, mlp_row_tile=16)

    adjs = [jax.block_until_ready(a) for a in adjs]

    # Sanity checks
    assert adjs[0].shape == (N, N) and adjs[1].shape == (N, N)
    assert adjs[2].shape == (B, N, N) and adjs[3].shape == (B, N, N)
    # adaptive adjacency: non-negative, at most top_k nonzeros per row, adjs[1]=adjs[0].T
    assert bool(jnp.all(adjs[0] >= 0.0))
    assert bool(jnp.all(jnp.sum(adjs[0] > 0.0, axis=1) <= TOP_K))
    assert bool(jnp.allclose(adjs[1], adjs[0].T))
    # attention maps: softmax rows sum to 1 (exact normalization now)
    assert bool(jnp.allclose(jnp.sum(adjs[2], axis=-1), 1.0, atol=1e-3))
    assert bool(jnp.allclose(jnp.sum(adjs[3], axis=-1), 1.0, atol=1e-3))

    print("KERNEL_OK")
</pallas_src>

<mosaic_0001>
module attributes {stable_mosaic.version = 11 : i64} {
  func.func @_emb_kernel(%arg0: memref<16x8xf32, #tpu.memory_space<vmem>>, %arg1: memref<16x8xf32, #tpu.memory_space<vmem>>, %arg2: memref<8x8xf32, #tpu.memory_space<vmem>>, %arg3: memref<1x8xf32, #tpu.memory_space<vmem>>, %arg4: memref<8x8xf32, #tpu.memory_space<vmem>>, %arg5: memref<1x8xf32, #tpu.memory_space<vmem>>, %arg6: memref<16x8xf32, #tpu.memory_space<vmem>>, %arg7: memref<16x8xf32, #tpu.memory_space<vmem>>) attributes {dimension_semantics = [], scalar_prefetch = 0 : i64, scratch_operands = 0 : i64, tpu.core_type = #tpu.core_type<tc>} {
    %c0 = arith.constant 0 : index
    %c0_0 = arith.constant 0 : index
    %0 = vector.load %arg0[%c0, %c0_0] : memref<16x8xf32, #tpu.memory_space<vmem>>, vector<16x8xf32>
    %c0_1 = arith.constant 0 : index
    %c0_2 = arith.constant 0 : index
    %1 = vector.load %arg2[%c0_1, %c0_2] : memref<8x8xf32, #tpu.memory_space<vmem>>, vector<8x8xf32>
    %cst = arith.constant dense<0.000000e+00> : vector<16x8xf32>
    %2 = tpu.matmul %0, %1, %cst {dimension_numbers = #tpu.dot_dimension_numbers<[1], [1], [0], [0], [0, 0, 1, 0], [], []>} : vector<16x8xf32>, vector<8x8xf32>, vector<16x8xf32> -> vector<16x8xf32>
    %c0_3 = arith.constant 0 : index
    %c0_4 = arith.constant 0 : index
    %3 = vector.load %arg3[%c0_3, %c0_4] : memref<1x8xf32, #tpu.memory_space<vmem>>, vector<1x8xf32>
    %4 = vector.broadcast %3 : vector<1x8xf32> to vector<16x8xf32>
    %5 = arith.addf %2, %4 : vector<16x8xf32>
    %cst_5 = arith.constant 3.000000e+00 : f32
    %6 = vector.broadcast %cst_5 : f32 to vector<16x8xf32>
    %7 = arith.mulf %6, %5 : vector<16x8xf32>
    %8 = math.tanh %7 : vector<16x8xf32>
    %c0_6 = arith.constant 0 : index
    %c0_7 = arith.constant 0 : index
    %9 = vector.load %arg6[%c0_6, %c0_7] : memref<16x8xf32, #tpu.memory_space<vmem>>, vector<16x8xf32>
    tpu.vector_store %arg6[%c0_6, %c0_7], %8 {strides = array<i32>} : memref<16x8xf32, #tpu.memory_space<vmem>>, vector<16x8xf32>,
    %c0_8 = arith.constant 0 : index
    %c0_9 = arith.constant 0 : index
    %10 = vector.load %arg1[%c0_8, %c0_9] : memref<16x8xf32, #tpu.memory_space<vmem>>, vector<16x8xf32>
    %c0_10 = arith.constant 0 : index
    %c0_11 = arith.constant 0 : index
    %11 = vector.load %arg4[%c0_10, %c0_11] : memref<8x8xf32, #tpu.memory_space<vmem>>, vector<8x8xf32>
    %cst_12 = arith.constant dense<0.000000e+00> : vector<16x8xf32>
    %12 = tpu.matmul %10, %11, %cst_12 {dimension_numbers = #tpu.dot_dimension_numbers<[1], [1], [0], [0], [0, 0, 1, 0], [], []>} : vector<16x8xf32>, vector<8x8xf32>, vector<16x8xf32> -> vector<16x8xf32>
    %c0_13 = arith.constant 0 : index
    %c0_14 = arith.constant 0 : index
    %13 = vector.load %arg5[%c0_13, %c0_14] : memref<1x8xf32, #tpu.memory_space<vmem>>, vector<1x8xf32>
    %14 = vector.broadcast %13 : vector<1x8xf32> to vector<16x8xf32>
    %15 = arith.addf %12, %14 : vector<16x8xf32>
    %cst_15 = arith.constant 3.000000e+00 : f32
    %16 = vector.broadcast %cst_15 : f32 to vector<16x8xf32>
    %17 = arith.mulf %16, %15 : vector<16x8xf32>
    %18 = math.tanh %17 : vector<16x8xf32>
    %c0_16 = arith.constant 0 : index
    %c0_17 = arith.constant 0 : index
    %19 = vector.load %arg7[%c0_16, %c0_17] : memref<16x8xf32, #tpu.memory_space<vmem>>, vector<16x8xf32>
    tpu.vector_store %arg7[%c0_16, %c0_17], %18 {strides = array<i32>} : memref<16x8xf32, #tpu.memory_space<vmem>>, vector<16x8xf32>,
    return
  }
}

</mosaic_0001>

<bundles_post_ra>
// kernel: tpu_custom_call.1
= control target key start
LH: loop header
LB: loop body
LE: loop exit
PB: predicated region body
PF: predicated region fallthrough
CT: control target
= control target key end

     0   :  { %vm35_vm0 = vcmask 64512   ;;  %s354_s2 = inlined_call_operand.vmem [shape: f32[8,8], index: 2, kind: input, shape index: {}]   ;;  %s355_s4 = inlined_call_operand.vmem [shape: f32[8,8], index: 4, kind: input, shape index: {}]   ;;  %s356_s0 = inlined_call_operand.vmem [shape: f32[16,8], index: 0, kind: input, shape index: {}]   ;;  %s357_s1 = inlined_call_operand.vmem [shape: f32[16,8], index: 1, kind: input, shape index: {}]   ;;  %s358_s3 = inlined_call_operand.vmem [shape: f32[1,8], index: 3, kind: input, shape index: {}]   ;;  %s359_s5 = inlined_call_operand.vmem [shape: f32[1,8], index: 5, kind: input, shape index: {}]   ;;  %s360_s6 = inlined_call_operand.vmem [shape: f32[16,8], index: 6, kind: output, shape index: {0}]   ;;  %s361_s7 = inlined_call_operand.vmem [shape: f32[16,8], index: 7, kind: output, shape index: {1}]  }
   0x1   :  { %v27_v0 = vld [vmem:[%s354_s2] sm:$0xff]  ;;  %v26_v4 = vld [vmem:[%s356_s0 + $0x8] sm:$0xff] }
   0x2   :  { %v128_v1 = vld [vmem:[%s355_s4] sm:$0xff]  ;;  %248 = vmatprep.subr.msk.mxu0 %vm35_vm0, %v27_v0  ;;  %v127_v5 = vld [vmem:[%s357_s1 + $0x8] sm:$0xff] }
   0x3   :  { %v25_v2 = vld [vmem:[%s356_s0] sm:$0xff]  ;;  %253 = vmatprep.subr.msk.mxu1 %vm35_vm0, %v128_v1  ;;  %249 = vmatpush3.xpose.msk.msra.mxu0 %vm35_vm0, %v27_v0 }
   0x4   :  { %v126_v3 = vld [vmem:[%s357_s1] sm:$0xff]  ;;  %254 = vmatpush3.xpose.msk.msra.mxu1 %vm35_vm0, %v128_v1  ;;  %250 = vmatprep.mubr.msk.f32.mxu0 %vm35_vm0, %v25_v2 }
   0x5   :  { %255 = vmatprep.mubr.msk.f32.mxu1 %vm35_vm0, %v126_v3  ;;  %v234_v6 = vld [vmem:[%s358_s3] ss:$0 sm:$0xff] }
   0x6   :  { %251 = vmatmul.mubr.msk.f32.vlgmr.msra.gmra.mrb[0].mxu0 %vm35_vm0, %v26_v4  ;;  %v238_v7 = vld [vmem:[%s359_s5] ss:$0 sm:$0xff] }
   0x7   :  { %256 = vmatmul.mubr.msk.f32.vlgmr.msra.gmra.mrb[0].mxu1 %vm35_vm0, %v127_v5 }
  0xd9   :  { %v252_v8 = vpop.f32.mrb[0].mxu0 }
  0xda   :  { %v257_v9 = vpop.f32.mrb[0].mxu1  ;;  %v117_v10 = vadd.f32 %v252_v8, %v234_v6  ;;  %v111_v12 = vpop.f32.mrb[1].mxu0 }
  0xdb   :  { %v217_v11 = vadd.f32 %v257_v9, %v238_v7  ;;  %v211_v13 = vpop.f32.mrb[1].mxu1  ;;  %v112_v14 = vadd.f32 %v234_v6, %v111_v12 }
  0xdc   :  { %v212_v15 = vadd.f32 %v238_v7, %v211_v13  ;;  %v121_v16 = vmul.f32 3.0, %v117_v10 }
  0xdd   :  { %v221_v17 = vmul.f32 3.0, %v217_v11  ;;  %v120_v18 = vmul.f32 3.0, %v112_v14 }
  0xde   :  { %v220_v19 = vmul.f32 3.0, %v212_v15  ;;  %258 = vtanh.f32 %v121_v16 }
  0xdf   :  { %260 = vtanh.f32 %v221_v17 }
  0xe0   :  { %262 = vtanh.f32 %v120_v18 }
  0xe1   :  { %264 = vtanh.f32 %v220_v19 }
  0xe8   :  { %v259_v20 = vpop.eup %258 }
  0xe9   :  { %v261_v21 = vpop.eup %260  ;;  %125 = vst.msk [vmem:[%s360_s6 + $0x8] sm:$0xff] %vm35_vm0, %v259_v20 }
  0xea   :  { %v263_v22 = vpop.eup %262  ;;  %225 = vst.msk [vmem:[%s361_s7 + $0x8] sm:$0xff] %vm35_vm0, %v261_v21 }
  0xeb   :  { %v265_v23 = vpop.eup %264  ;;  %124 = vst.msk [vmem:[%s360_s6] sm:$0xff] %vm35_vm0, %v263_v22 }
  0xec   :  { %224 = vst.msk [vmem:[%s361_s7] sm:$0xff] %vm35_vm0, %v265_v23 }

</bundles_post_ra>
